<compile_context>
chip_gen: v7x
topology: tpu7x:2x2x1
jax: 0.10.0
libtpu: 0.0.40
codegen_flags: <defaults>
</compile_context>

<pallas_src>
import numpy as np
import jax
import jax.numpy as jnp
from jax import lax
from jax.experimental import pallas as pl
from jax.experimental.pallas import tpu as pltpu


# -----------------------------------------------------------------------------
# Pallas kernel: fused ConvTranspose3d(k=2,s=2) + BatchNorm3d(eval) + ReLU
# -----------------------------------------------------------------------------
def _upconv_bn_relu_kernel(rows_ref, w_ref, c_ref, o_ref):
    # rows_ref: (tm, Cin)      bf16 input voxels (channels-last)
    # w_ref   : (Cin, 8*Cout)  bf16 weights, BN scale pre-folded
    # c_ref   : (1, 8*Cout)    f32 per-column constant (bias*scale + shift)
    # o_ref   : (tm, 8*Cout)   f32 output (lane-dense: 8*Cout is a mult. of 128)
    y = jnp.dot(rows_ref[...], w_ref[...],
                preferred_element_type=jnp.float32) + c_ref[...]
    o_ref[...] = jnp.maximum(y, 0.0).astype(o_ref.dtype)


def up_transition_forward(x_ncdhw, packed, *, tm=256):
    """x: (N, Cin, D, H, W) f32  ->  (N, Cout, 2D, 2H, 2W) f32."""
    w_bf16, const = packed                       # (Cin, 8*Cout) bf16, (1, 8*Cout) f32
    Cin, KT = w_bf16.shape
    Cout = KT // 8
    N, C, D, H, W = x_ncdhw.shape
    assert C == Cin, (C, Cin)

    # --- boundary glue: NCDHW -> NDHWC -> rows of voxels (no im2col blowup) ---
    x = jnp.transpose(x_ncdhw, (0, 2, 3, 4, 1))
    rows = x.reshape(N * D * H * W, Cin).astype(jnp.bfloat16)
    R = rows.shape[0]

    # Robust tiling: pad rows up to a multiple of tm, slice result afterwards.
    Rp = pl.cdiv(R, tm) * tm
    if Rp != R:
        rows = jnp.pad(rows, ((0, Rp - R), (0, 0)))

    out_rows = pl.pallas_call(
        _upconv_bn_relu_kernel,
        out_shape=jax.ShapeDtypeStruct((Rp, KT), jnp.float32),
        grid_spec=pltpu.PrefetchScalarGridSpec(
            num_scalar_prefetch=0,
            grid=(Rp // tm,),
            in_specs=[
                pl.BlockSpec((tm, Cin), lambda i: (i, 0)),
                pl.BlockSpec((Cin, KT), lambda i: (0, 0)),
                pl.BlockSpec((1, KT), lambda i: (0, 0)),
            ],
            out_specs=pl.BlockSpec((tm, KT), lambda i: (i, 0)),
        ),
        compiler_params=pltpu.CompilerParams(
            dimension_semantics=("parallel",)),
    )(rows, w_bf16, const)

    out_rows = out_rows[:R]
    # (R, 8*Cout) -> (N, D, H, W, kd, kh, kw, Cout) -> interleave taps into
    # the doubled spatial dims -> NCDHW.
    y = out_rows.reshape(N, D, H, W, 2, 2, 2, Cout)
    y = jnp.transpose(y, (0, 1, 4, 2, 5, 3, 6, 7)).reshape(N, 2 * D, 2 * H, 2 * W, Cout)
    return jnp.transpose(y, (0, 4, 1, 2, 3))


# -----------------------------------------------------------------------------
# Parameter construction / host-side folding
# -----------------------------------------------------------------------------
def init_up_transition(key, in_channels, out_channels):
    ks = jax.random.split(key, 6)
    return dict(
        # nn.ConvTranspose3d weight layout: (Cin, Cout, kD, kH, kW)
        weight=0.1 * jax.random.normal(ks[0], (in_channels, out_channels, 2, 2, 2), jnp.float32),
        bias=0.05 * jax.random.normal(ks[1], (out_channels,), jnp.float32),
        gamma=1.0 + 0.1 * jax.random.normal(ks[2], (out_channels,), jnp.float32),
        beta=0.05 * jax.random.normal(ks[3], (out_channels,), jnp.float32),
        rmean=0.05 * jax.random.normal(ks[4], (out_channels,), jnp.float32),
        rvar=1.0 + 0.1 * jnp.abs(jax.random.normal(ks[5], (out_channels,), jnp.float32)),
    )


def pack_for_kernel(p, eps=1e-5):
    w = p["weight"]                                 # (Cin, Cout, 2, 2, 2)
    Cin, Cout = w.shape[0], w.shape[1]
    s = p["gamma"] / jnp.sqrt(p["rvar"] + eps)      # BN scale
    t = p["beta"] - p["rmean"] * s                  # BN shift
    # Columns ordered tap-major (kd, kh, kw), channel-minor -> last dim 8*Cout.
    wmat = jnp.transpose(w, (0, 2, 3, 4, 1)).reshape(Cin, 8 * Cout)
    wfold = wmat * jnp.tile(s, 8)[None, :]          # fold BN scale into weights
    const = jnp.tile(p["bias"] * s + t, 8)[None, :].astype(jnp.float32)
    return wfold.astype(jnp.bfloat16), const


# -----------------------------------------------------------------------------
# Pure-JAX reference (f32, HIGHEST precision) for validation
# -----------------------------------------------------------------------------
def up_transition_reference(x_ncdhw, p, eps=1e-5):
    x = jnp.transpose(x_ncdhw, (0, 2, 3, 4, 1))     # NCDHW -> NDHWC
    N, D, H, W, Cin = x.shape
    w = p["weight"]                                 # (Cin, Cout, 2, 2, 2)
    Cout = w.shape[1]
    y = jnp.einsum("ndhwc,copqr->ndhwpqro", x, w,
                   precision=lax.Precision.HIGHEST)  # (N,D,H,W,2,2,2,Cout)
    y = jnp.transpose(y, (0, 1, 4, 2, 5, 3, 6, 7)).reshape(N, 2 * D, 2 * H, 2 * W, Cout)
    y = y + p["bias"]
    s = p["gamma"] / jnp.sqrt(p["rvar"] + eps)
    t = p["beta"] - p["rmean"] * s
    y = jnp.maximum(y * s + t, 0.0)
    return jnp.transpose(y, (0, 4, 1, 2, 3))


# -----------------------------------------------------------------------------
if __name__ == "__main__":
    key = jax.random.PRNGKey(0)
    k_x, k_p = jax.random.split(key, 2)

    # Module config: UpTransition(in_channels=8, out_channels=16)
    in_channels, out_channels = 8, 16
    N, D, H, W = 2, 8, 8, 8
    x = jax.random.normal(k_x, (N, in_channels, D, H, W), jnp.float32)   # NCDHW

    raw = init_up_transition(k_p, in_channels, out_channels)
    packed = pack_for_kernel(raw)

    out = jax.block_until_ready(up_transition_forward(x, packed))
    assert out.shape == (N, out_channels, 2 * D, 2 * H, 2 * W), out.shape

    ref = jax.block_until_ready(up_transition_reference(x, raw))
    # bf16 MXU inputs (f32 accumulate) vs f32 HIGHEST reference: loose tolerance.
    np.testing.assert_allclose(np.asarray(out), np.asarray(ref), rtol=2e-2, atol=2e-2)

    print("KERNEL_OK")
</pallas_src>

<mosaic_0001>
module attributes {stable_mosaic.version = 11 : i64} {
  func.func @_upconv_bn_relu_kernel(%arg0: i32, %arg1: memref<256x8xbf16, #tpu.memory_space<vmem>>, %arg2: memref<8x128xbf16, #tpu.memory_space<vmem>>, %arg3: memref<1x128xf32, #tpu.memory_space<vmem>>, %arg4: memref<256x128xf32, #tpu.memory_space<vmem>>) attributes {dimension_semantics = [#tpu.dimension_semantics<parallel>], iteration_bounds = array<i64: 4>, scalar_prefetch = 0 : i64, scratch_operands = 0 : i64, tpu.core_type = #tpu.core_type<tc>, window_params = [{transform_indices = @transform_0, window_bounds = array<i64: 256, 8>}, {pipeline_mode = #tpu.pipeline_mode<synchronous>, transform_indices = @transform_1, window_bounds = array<i64: 8, 128>}, {pipeline_mode = #tpu.pipeline_mode<synchronous>, transform_indices = @transform_2, window_bounds = array<i64: 1, 128>}, {transform_indices = @transform_3, window_bounds = array<i64: 256, 128>}]} {
    %c0 = arith.constant 0 : index
    %c0_0 = arith.constant 0 : index
    %0 = vector.load %arg1[%c0, %c0_0] : memref<256x8xbf16, #tpu.memory_space<vmem>>, vector<256x8xbf16>
    %c0_1 = arith.constant 0 : index
    %c0_2 = arith.constant 0 : index
    %1 = vector.load %arg2[%c0_1, %c0_2] : memref<8x128xbf16, #tpu.memory_space<vmem>>, vector<8x128xbf16>
    %cst = arith.constant dense<0.000000e+00> : vector<256x128xf32>
    %2 = tpu.matmul %0, %1, %cst {dimension_numbers = #tpu.dot_dimension_numbers<[1], [0], [0], [1], [0, 0, 1, 1], [], []>} : vector<256x8xbf16>, vector<8x128xbf16>, vector<256x128xf32> -> vector<256x128xf32>
    %c0_3 = arith.constant 0 : index
    %c0_4 = arith.constant 0 : index
    %3 = vector.load %arg3[%c0_3, %c0_4] : memref<1x128xf32, #tpu.memory_space<vmem>>, vector<1x128xf32>
    %4 = vector.broadcast %3 : vector<1x128xf32> to vector<256x128xf32>
    %5 = arith.addf %2, %4 : vector<256x128xf32>
    %cst_5 = arith.constant 0.000000e+00 : f32
    %6 = vector.broadcast %cst_5 : f32 to vector<256x128xf32>
    %7 = arith.maximumf %5, %6 : vector<256x128xf32>
    %c0_6 = arith.constant 0 : index
    %c0_7 = arith.constant 0 : index
    %8 = vector.load %arg4[%c0_6, %c0_7] : memref<256x128xf32, #tpu.memory_space<vmem>>, vector<256x128xf32>
    tpu.vector_store %arg4[%c0_6, %c0_7], %7 {strides = array<i32>} : memref<256x128xf32, #tpu.memory_space<vmem>>, vector<256x128xf32>,
    return
  }
  func.func @transform_0(%arg0: i32) -> (i32, i32) {
    %c0_i32 = arith.constant 0 : i32
    %c0_i32_0 = arith.constant 0 : i32
    return %arg0, %c0_i32 : i32, i32
  }
  func.func @transform_1(%arg0: i32) -> (i32, i32) {
    %c0_i32 = arith.constant 0 : i32
    %c0_i32_0 = arith.constant 0 : i32
    %c0_i32_1 = arith.constant 0 : i32
    return %c0_i32, %c0_i32_0 : i32, i32
  }
  func.func @transform_2(%arg0: i32) -> (i32, i32) {
    %c0_i32 = arith.constant 0 : i32
    %c0_i32_0 = arith.constant 0 : i32
    %c0_i32_1 = arith.constant 0 : i32
    return %c0_i32, %c0_i32_0 : i32, i32
  }
  func.func @transform_3(%arg0: i32) -> (i32, i32) {
    %c0_i32 = arith.constant 0 : i32
    %c0_i32_0 = arith.constant 0 : i32
    return %arg0, %c0_i32 : i32, i32
  }
}

</mosaic_0001>

<bundles_post_ra>
// kernel: tpu_custom_call.1
= control target key start
LH: loop header
LB: loop body
LE: loop exit
PB: predicated region body
PF: predicated region fallthrough
CT: control target
= control target key end

     0   :  { %8 = vsyncpa [#allocation3], 0  ;;  %s1107_s0 = inlined_call_operand.vmem [shape: bf16[1024,8], index: 0, kind: input, shape index: {}]   ;;  %s1108_s1 = inlined_call_operand.vmem [shape: bf16[8,128], index: 1, kind: input, shape index: {}]   ;;  %s1109_s2 = inlined_call_operand.vmem [shape: f32[1,128], index: 2, kind: input, shape index: {}]   ;;  %s1110_s3 = inlined_call_operand.hbm [shape: f32[1024,128], index: 3, kind: output, shape index: {}]  }
   0x1   :  { %10 = vsyncpa [#allocation3 + $0x1], 0  ;;  %s892_s12 = smov 0   ;;  %s894_s13 = smov 0  }
   0x2   :  { %s896_s14 = smov 0   ;;  %s898_s15 = smov 0  }
   0x3 LB: > { %s913_s16 = sadd.s32 4294967295, %s867_s15   ;;  %s647_s17 = sadd.s32 4294967294, %s867_s15   ;;  %s867_s15 = sphi %s898_s15, %s1116_s15   ;;  %s863_s14 = sphi %s896_s14, %s1115_s14   ;;  %s859_s13 = sphi %s894_s13, %s1114_s13   ;;  %s855_s12 = sphi %s892_s12, %s1113_s12  }
   0x4   : > { %s917_s18 = sadd.s32 1, %s867_s15   ;;  %s91_s19 = sadd.s32 1, %s863_s14 }
   0x5   : > { %s88_s20 = ssub.s32 %s867_s15, %s917_s18  ;;  %p101_p0 = scmp.ne.s32.totalorder %s863_s14, %s859_s13 }
   0x6   : > { %p89_p1 = scmp.eq.s32.totalorder %s88_s20, 0  ;;  %p102_p2 = scmp.eq.s32.totalorder %s913_s16, 3 }
   0x7   : > { %p107_p3 = scmp.ne.s32.totalorder %s859_s13, %s855_s12  ;;  %p108_p4 = scmp.eq.s32.totalorder %s647_s17, 3 }
   0x8   : > { %s928_s21 = scalar_select %p89_p1, %s863_s14, %s91_s19  }
   0x9   : > { %p930_p5 = por %p102_p2, %p101_p0  ;;  %p934_p6 = por %p108_p4, %p107_p3 }
   0xa   : > { %p650_p7 = scmp.ge.s32.totalorder %s867_s15, 1  ;;  %p141_p8 = scmp.lt.s32.totalorder %s867_s15, 5 }
   0xc   : > { %p142_p9 = pnand %p650_p7, %p141_p8 }
   0xd   : > { %v205_v0 = vld [vmem:[%s1108_s1] sm:$0xf] (!%p142_p9)  ;;  %vm342_vm0 = vcmask (!%p142_p9), 1043456   ;;  %s652_s26 = sshll.u32 (!%p142_p9), %s913_s16, 5  ;;  %vm293_vm1 = vcmask (!%p142_p9), 64512   ;;  %s162_s4 = sand.u32 (!%p142_p9), 1, %s859_s13  }
   0xe   : > { %145 = sbr.rel (%p142_p9) target bundleno = 285 (0x11d), region = 32  ;;  %746 = vmatprep.subr.msk.bf16.mxu0 (!%p142_p9), %vm342_vm0, %v205_v0  ;;  %747 = vmatprep.subr.msk.bf16.mxu1 (!%p142_p9), %vm342_vm0, %v205_v0  ;;  %v344_v1 = vsel (!%p142_p9), %vm342_vm0, %v205_v0, 0  ;;  %p166_p10 = scmp.lt.s32.totalorder (!%p142_p9), %s652_s26, 127  ;;  %v985_v18 = vld [vmem:[%s1109_s2] ss:$0 sm:$0xff] (!%p142_p9) }
   0xf   : > { %711 = vmatpush3.bf16.msra.mxu0 (!%p142_p9), %v344_v1  ;;  %745 = vmatpush3.bf16.msra.mxu1 (!%p142_p9), %v344_v1  ;;  %s651_s7 = sshll.u32 (!%p142_p9), %s162_s4, 8  ;;  %s692_s9 = sshll.u32 (!%p142_p9), %s913_s16, 12 }
  0x10   : > { %s996_s8 = scalar_lea.vmem (!%p142_p9), [#allocation2], %s651_s7  ;;  %s1055_s17 = scalar_lea.hbm (!%p142_p9), %s1110_s3, %s692_s9 }
  0x11   : > { %s585_s10 = sshll.u32 (!%p142_p9), %s996_s8, 4  ;;  %s1066_s19 = scalar_lea.sflag (!%p142_p9), [#allocation3], %s162_s4  ;;  %s1057_s10 = int_to_ptr.vmem [resolvable:$true] %s585_s10 }
  0x12   : > { %s805_s20 = scalar_lea.vmem (!%p142_p9), %s1057_s10, 4096  ;;  %s869_s24 = smov (!%p142_p9), [#allocation2]  }
  0x13   : > { %p806_p11 = scmp.ne.s32.totalorder (!%p142_p9), %s1057_s10, %s805_s20  ;;  %s809_s25 = sshll.u32 (!%p142_p9), %s869_s24, 4  ;;  %s810_s25 = int_to_ptr.vmem [resolvable:$false] %s809_s25 }
  0x14   : > { %p812_p0 = scmp.lt.s32.totalorder (!%p142_p9), %s1057_s10, %s810_s25 }
  0x15   : > { %s1118_s26 = smov (!%p166_p10, %s652_s26), 127  ;;  %p807_p12 = pnand %p806_p11, %p930_p5 }
  0x16   : > { %s653_s27 = sshll.u32 %s1118_s26, 2  ;;  %s811_s26 = scalar_lea.vmem %s810_s25, 8192 }
  0x17   : > { %s947_s30 = scalar_lea.vmem %s1107_s0, %s653_s27  ;;  %p808_p13 = pneg %p807_p12 }
  0x18   : > { %v789_v2 = vld [vmem:[%s947_s30] sm:$0xff]   ;;  %v791_v4 = vld [vmem:[%s947_s30 + $0x8] sm:$0xff]   ;;  %v793_v6 = vld [vmem:[%s947_s30 + $0x10] sm:$0xff]   ;;  %p813_p1 = scmp.lt.s32.totalorder %s811_s26, %s805_s20 }
  0x19   : > { %v790_v3 = vld [vmem:[%s947_s30 + $0x40] sm:$0xff]   ;;  %712 = vmatprep.mubr.msk.bf16.mxu0 %vm293_vm1, %v789_v2  ;;  %v792_v5 = vld [vmem:[%s947_s30 + $0x48] sm:$0xff]   ;;  %v794_v7 = vld [vmem:[%s947_s30 + $0x50] sm:$0xff]  }
  0x1a   : > { %728 = vmatprep.mubr.msk.bf16.mxu1 %vm293_vm1, %v790_v3  ;;  %713 = vmatmul.mubr.msk.bf16.vlgmr.msra.gmra.mrb[0].mxu0 %vm293_vm1, %v791_v4  ;;  %v795_v8 = vld [vmem:[%s947_s30 + $0x18] sm:$0xff]   ;;  %v797_v10 = vld [vmem:[%s947_s30 + $0x20] sm:$0xff]   ;;  %v799_v12 = vld [vmem:[%s947_s30 + $0x28] sm:$0xff]   ;;  %p814_p2 = por %p813_p1, %p812_p0 }
  0x1b   : > { %729 = vmatmul.mubr.msk.bf16.vlgmr.msra.gmra.mrb[0].mxu1 %vm293_vm1, %v792_v5  ;;  %716 = vmatprep.mubr.msk.bf16.mxu0 %vm293_vm1, %v793_v6  ;;  %v796_v9 = vld [vmem:[%s947_s30 + $0x58] sm:$0xff]   ;;  %v798_v11 = vld [vmem:[%s947_s30 + $0x60] sm:$0xff]   ;;  %v800_v13 = vld [vmem:[%s947_s30 + $0x68] sm:$0xff]  }
  0x1c   : > { %732 = vmatprep.mubr.msk.bf16.mxu1 %vm293_vm1, %v794_v7  ;;  %v801_v14 = vld [vmem:[%s947_s30 + $0x30] sm:$0xff]   ;;  %v803_v16 = vld [vmem:[%s947_s30 + $0x38] sm:$0xff]   ;;  %p815_p3 = pnand %p814_p2, %p808_p13 }
  0x1d   : > { %v802_v15 = vld [vmem:[%s947_s30 + $0x70] sm:$0xff]   ;;  %v804_v17 = vld [vmem:[%s947_s30 + $0x78] sm:$0xff]  }
  0x22   : > { %717 = vmatmul.mubr.msk.bf16.gmra.mrb[4].mxu0 %vm293_vm1, %v795_v8 }
  0x23   : > { %733 = vmatmul.mubr.msk.bf16.gmra.mrb[4].mxu1 %vm293_vm1, %v796_v9  ;;  %720 = vmatprep.mubr.msk.bf16.mxu0 %vm293_vm1, %v797_v10 }
  0x24   : > { %736 = vmatprep.mubr.msk.bf16.mxu1 %vm293_vm1, %v798_v11 }
  0x2a   : > { %721 = vmatmul.mubr.msk.bf16.gmra.mrb[8].mxu0 %vm293_vm1, %v799_v12 }
  0x2b   : > { %737 = vmatmul.mubr.msk.bf16.gmra.mrb[8].mxu1 %vm293_vm1, %v800_v13  ;;  %724 = vmatprep.mubr.msk.bf16.mxu0 %vm293_vm1, %v801_v14 }
  0x2c   : > { %740 = vmatprep.mubr.msk.bf16.mxu1 %vm293_vm1, %v802_v15 }
  0x32   : > { %725 = vmatmul.mubr.msk.bf16.gmra.mrb[12].mxu0 %vm293_vm1, %v803_v16 }
  0x33   : > { %741 = vmatmul.mubr.msk.bf16.gmra.mrb[12].mxu1 %vm293_vm1, %v804_v17 }
  0xed   : > { %v714_v19 = vpop.f32.mrb[0].mxu0 }
  0xee   : > { %v389_v20 = vadd.f32 %v714_v19, %v985_v18  ;;  %v730_v21 = vpop.f32.mrb[0].mxu1  ;;  %v380_v22 = vpop.f32.mrb[1].mxu0 }
  0xef   : > { %v453_v23 = vadd.f32 %v730_v21, %v985_v18  ;;  %v381_v24 = vadd.f32 %v985_v18, %v380_v22  ;;  %v444_v25 = vpop.f32.mrb[1].mxu1  ;;  %v715_v26 = vpop.f32.mrb[2].mxu0 }
  0xf0   : > { %v509_v27 = vmax.f32 %v389_v20, 0.0  ;;  %v445_v28 = vadd.f32 %v985_v18, %v444_v25  ;;  %v392_v29 = vadd.f32 %v715_v26, %v985_v18  ;;  %v731_v30 = vpop.f32.mrb[2].mxu1  ;;  %v383_v31 = vpop.f32.mrb[3].mxu0 }
  0xf1   : > { %v525_v32 = vmax.f32 %v453_v23, 0.0  ;;  %v507_v33 = vmax.f32 %v381_v24, 0.0  ;;  %v456_v34 = vadd.f32 %v731_v30, %v985_v18  ;;  %v384_v35 = vadd.f32 %v985_v18, %v383_v31  ;;  %v447_v36 = vpop.f32.mrb[3].mxu1 }
  0xf2   : > { %541 = vst [vmem:[%s996_s8 + $0x10] sm:$0xff] %v509_v27  ;;  %v523_v37 = vmax.f32 %v445_v28, 0.0  ;;  %v510_v38 = vmax.f32 %v392_v29, 0.0  ;;  %v448_v39 = vadd.f32 %v985_v18, %v447_v36 }
  0xf3   : > { %557 = vst [vmem:[%s996_s8 + $0x90] sm:$0xff] %v525_v32  ;;  %539 = vst [vmem:[%s996_s8] sm:$0xff] %v507_v33  ;;  %v526_v40 = vmax.f32 %v456_v34, 0.0  ;;  %v508_v41 = vmax.f32 %v384_v35, 0.0 }
  0xf4   : > { %555 = vst [vmem:[%s996_s8 + $0x80] sm:$0xff] %v523_v37  ;;  %542 = vst [vmem:[%s996_s8 + $0x18] sm:$0xff] %v510_v38  ;;  %v524_v42 = vmax.f32 %v448_v39, 0.0 }
  0xf5   : > { %558 = vst [vmem:[%s996_s8 + $0x98] sm:$0xff] %v526_v40  ;;  %540 = vst [vmem:[%s996_s8 + $0x8] sm:$0xff] %v508_v41  ;;  %v718_v43 = vpop.f32.mrb[4].mxu0 }
  0xf6   : > { %556 = vst [vmem:[%s996_s8 + $0x88] sm:$0xff] %v524_v42  ;;  %v405_v44 = vadd.f32 %v718_v43, %v985_v18  ;;  %v734_v45 = vpop.f32.mrb[4].mxu1  ;;  %v396_v46 = vpop.f32.mrb[5].mxu0 }
  0xf7   : > { %v469_v47 = vadd.f32 %v734_v45, %v985_v18  ;;  %v397_v48 = vadd.f32 %v985_v18, %v396_v46  ;;  %v460_v49 = vpop.f32.mrb[5].mxu1  ;;  %v719_v50 = vpop.f32.mrb[6].mxu0 }
  0xf8   : > { %v513_v51 = vmax.f32 %v405_v44, 0.0  ;;  %v461_v52 = vadd.f32 %v985_v18, %v460_v49  ;;  %v408_v53 = vadd.f32 %v719_v50, %v985_v18  ;;  %v735_v54 = vpop.f32.mrb[6].mxu1  ;;  %v399_v55 = vpop.f32.mrb[7].mxu0 }
  0xf9   : > { %v529_v56 = vmax.f32 %v469_v47, 0.0  ;;  %v511_v57 = vmax.f32 %v397_v48, 0.0  ;;  %v472_v58 = vadd.f32 %v735_v54, %v985_v18  ;;  %v400_v59 = vadd.f32 %v985_v18, %v399_v55  ;;  %v463_v60 = vpop.f32.mrb[7].mxu1 }
  0xfa   : > { %545 = vst [vmem:[%s996_s8 + $0x30] sm:$0xff] %v513_v51  ;;  %v527_v61 = vmax.f32 %v461_v52, 0.0  ;;  %v514_v62 = vmax.f32 %v408_v53, 0.0  ;;  %v464_v63 = vadd.f32 %v985_v18, %v463_v60 }
  0xfb   : > { %561 = vst [vmem:[%s996_s8 + $0xb0] sm:$0xff] %v529_v56  ;;  %543 = vst [vmem:[%s996_s8 + $0x20] sm:$0xff] %v511_v57  ;;  %v530_v0 = vmax.f32 %v472_v58, 0.0  ;;  %v512_v1 = vmax.f32 %v400_v59, 0.0 }
  0xfc   : > { %559 = vst [vmem:[%s996_s8 + $0xa0] sm:$0xff] %v527_v61  ;;  %546 = vst [vmem:[%s996_s8 + $0x38] sm:$0xff] %v514_v62  ;;  %v528_v2 = vmax.f32 %v464_v63, 0.0 }
  0xfd   : > { %562 = vst [vmem:[%s996_s8 + $0xb8] sm:$0xff] %v530_v0  ;;  %544 = vst [vmem:[%s996_s8 + $0x28] sm:$0xff] %v512_v1  ;;  %v722_v3 = vpop.f32.mrb[8].mxu0 }
  0xfe   : > { %560 = vst [vmem:[%s996_s8 + $0xa8] sm:$0xff] %v528_v2  ;;  %v421_v4 = vadd.f32 %v722_v3, %v985_v18  ;;  %v738_v5 = vpop.f32.mrb[8].mxu1  ;;  %v412_v6 = vpop.f32.mrb[9].mxu0 }
  0xff   : > { %v485_v7 = vadd.f32 %v738_v5, %v985_v18  ;;  %v413_v8 = vadd.f32 %v985_v18, %v412_v6  ;;  %v476_v9 = vpop.f32.mrb[9].mxu1  ;;  %v723_v10 = vpop.f32.mrb[10].mxu0 }
 0x100   : > { %v517_v11 = vmax.f32 %v421_v4, 0.0  ;;  %v477_v12 = vadd.f32 %v985_v18, %v476_v9  ;;  %v424_v13 = vadd.f32 %v723_v10, %v985_v18  ;;  %v739_v14 = vpop.f32.mrb[10].mxu1  ;;  %v415_v15 = vpop.f32.mrb[11].mxu0 }
 0x101   : > { %v533_v16 = vmax.f32 %v485_v7, 0.0  ;;  %v515_v17 = vmax.f32 %v413_v8, 0.0  ;;  %v488_v19 = vadd.f32 %v739_v14, %v985_v18  ;;  %v416_v20 = vadd.f32 %v985_v18, %v415_v15  ;;  %v479_v21 = vpop.f32.mrb[11].mxu1 }
 0x102   : > { %549 = vst [vmem:[%s996_s8 + $0x50] sm:$0xff] %v517_v11  ;;  %v531_v22 = vmax.f32 %v477_v12, 0.0  ;;  %v518_v23 = vmax.f32 %v424_v13, 0.0  ;;  %v480_v24 = vadd.f32 %v985_v18, %v479_v21 }
 0x103   : > { %565 = vst [vmem:[%s996_s8 + $0xd0] sm:$0xff] %v533_v16  ;;  %547 = vst [vmem:[%s996_s8 + $0x40] sm:$0xff] %v515_v17  ;;  %v534_v25 = vmax.f32 %v488_v19, 0.0  ;;  %v516_v26 = vmax.f32 %v416_v20, 0.0 }
 0x104   : > { %563 = vst [vmem:[%s996_s8 + $0xc0] sm:$0xff] %v531_v22  ;;  %550 = vst [vmem:[%s996_s8 + $0x58] sm:$0xff] %v518_v23  ;;  %v532_v27 = vmax.f32 %v480_v24, 0.0 }
 0x105   : > { %566 = vst [vmem:[%s996_s8 + $0xd8] sm:$0xff] %v534_v25  ;;  %548 = vst [vmem:[%s996_s8 + $0x48] sm:$0xff] %v516_v26  ;;  %v726_v28 = vpop.f32.mrb[12].mxu0 }
 0x106   : > { %564 = vst [vmem:[%s996_s8 + $0xc8] sm:$0xff] %v532_v27  ;;  %v437_v29 = vadd.f32 %v726_v28, %v985_v18  ;;  %v742_v30 = vpop.f32.mrb[12].mxu1  ;;  %v428_v31 = vpop.f32.mrb[13].mxu0 }
 0x107   : > { %v501_v32 = vadd.f32 %v742_v30, %v985_v18  ;;  %v429_v33 = vadd.f32 %v985_v18, %v428_v31  ;;  %v492_v34 = vpop.f32.mrb[13].mxu1  ;;  %v727_v35 = vpop.f32.mrb[14].mxu0 }
 0x108   : > { %v521_v36 = vmax.f32 %v437_v29, 0.0  ;;  %v493_v37 = vadd.f32 %v985_v18, %v492_v34  ;;  %v440_v38 = vadd.f32 %v727_v35, %v985_v18  ;;  %v743_v39 = vpop.f32.mrb[14].mxu1  ;;  %v431_v40 = vpop.f32.mrb[15].mxu0 }
 0x109   : > { %v537_v41 = vmax.f32 %v501_v32, 0.0  ;;  %v519_v42 = vmax.f32 %v429_v33, 0.0  ;;  %v504_v43 = vadd.f32 %v743_v39, %v985_v18  ;;  %v432_v44 = vadd.f32 %v985_v18, %v431_v40  ;;  %v495_v45 = vpop.f32.mrb[15].mxu1 }
 0x10a   : > { %553 = vst [vmem:[%s996_s8 + $0x70] sm:$0xff] %v521_v36  ;;  %v535_v46 = vmax.f32 %v493_v37, 0.0  ;;  %v522_v47 = vmax.f32 %v440_v38, 0.0  ;;  %v496_v48 = vadd.f32 %v985_v18, %v495_v45 }
 0x10b   : > { %569 = vst [vmem:[%s996_s8 + $0xf0] sm:$0xff] %v537_v41  ;;  %551 = vst [vmem:[%s996_s8 + $0x60] sm:$0xff] %v519_v42  ;;  %v538_v49 = vmax.f32 %v504_v43, 0.0  ;;  %v520_v50 = vmax.f32 %v432_v44, 0.0 }
 0x10c   : > { %567 = vst [vmem:[%s996_s8 + $0xe0] sm:$0xff] %v535_v46  ;;  %554 = vst [vmem:[%s996_s8 + $0x78] sm:$0xff] %v522_v47  ;;  %v536_v51 = vmax.f32 %v496_v48, 0.0 }
 0x10d   : > { %570 = vst [vmem:[%s996_s8 + $0xf8] sm:$0xff] %v538_v49  ;;  %552 = vst [vmem:[%s996_s8 + $0x68] sm:$0xff] %v520_v50 }
 0x10e   : > { %568 = vst [vmem:[%s996_s8 + $0xe8] sm:$0xff] %v536_v51 }
 0x10f   : > { %818 = shalt.err (!%p815_p3)
}
 0x110   : > { %s819_s27 = scalar_lea.hbm %s1055_s17, 4096  ;;  %s823_s30 = scalar_lea.hbm %s1110_s3, 16384 }
 0x111   : > { %p820_p4 = scmp.ne.s32.totalorder %s1055_s17, %s819_s27  ;;  %p824_p9 = scmp.lt.u32.totalorder %s1055_s17, %s1110_s3 }
 0x112   : > { %p825_p10 = scmp.lt.u32.totalorder %s823_s30, %s819_s27  ;;  %p827_p12 = scmp.lt.u32.totalorder %s819_s27, %s1055_s17 }
 0x113   : > { %p821_p7 = pnand %p820_p4, %p930_p5 }
 0x114   : > { %p826_p11 = por %p825_p10, %p824_p9 }
 0x115   : > { %p822_p8 = pneg %p821_p7 }
 0x116   : > { %p828_p13 = por %p827_p12, %p826_p11 }
 0x118   : > { %p829_p0 = pnand %p828_p13, %p822_p8 }
 0x11a   : > { %832 = shalt.err (!%p829_p0)
}
 0x11b   : > { %s870_s6 = smov 128   ;;  %s871_s7 = smov 8  }
 0x11c   : > { %748 = dma.vmem_to_hbm [thread:$0]  (%p930_p5), %s1057_s10, 4096, %s1055_s17, %s1066_s19, %s870_s6, %s870_s6, %s871_s7  }
 0x11d PF: > { %p754_p1 = scmp.ge.s32.totalorder %s867_s15, 2  ;;  %s600_s8 = sand.u32 1, %s855_s12  }
 0x11e   : > { %s601_s9 = scalar_lea.sflag [#allocation3], %s600_s8 }
 0x11f   : > { %p751_p2 = pnand %p754_p1, %p934_p6 }
 0x121   : > { %850 = dma.done.wait (!%p751_p2), %s601_s9, 4096  }
 0x122   : > { %852 = vsyncadd (!%p751_p2), %s601_s9, 4294963200  ;;  %p13_p3 = scmp.ge.s32.totalorder %s917_s18, 6   ;;  %s1113_s12 = smov %s859_s13 }
 0x123   : > { %s1114_s13 = smov %s863_s14  ;;  %s1115_s14 = smov %s928_s21 }
 0x124   : > { %s1116_s15 = smov %s917_s18  ;;  %15 = sbr.rel (!%p13_p3) target bundleno = 3 (0x3), region = 67 }
 0x12b   :  { %606 = vsyncpa [#allocation3], 1 }
 0x12c   :  { %608 = vsyncpa [#allocation3 + $0x1], 1 }

</bundles_post_ra>
